<compile_context>
chip_gen: v7x
topology: tpu7x:2x2x1
jax: 0.10.0
libtpu: 0.0.40
codegen_flags: <defaults>
</compile_context>

<pallas_src>
import jax
import jax.numpy as jnp
from jax.experimental import pallas as pl
from jax.experimental.pallas import tpu as pltpu


def _cfg_denoiser_kernel(z_ref, ccc_ref, ccu_ref,
                         w1z_ref, w1cc_ref, w1cu_ref, beff_ref, out_ref):
    # z_ref    : VMEM (C,    T)     latent tile (shared by all 3 CFG branches)
    # ccc_ref  : VMEM (Ccat, T)     cond   c_concat tile
    # ccu_ref  : VMEM (Ccat, T)     uncond c_concat tile
    # w1z_ref  : VMEM (Cout, C)     1x1-conv weight, z slice (pre-transposed)
    # w1cc_ref : VMEM (Cout, Ccat)  weight * image_cfg_scale       (cond concat)
    # w1cu_ref : VMEM (Cout, Ccat)  weight * (1 - image_cfg_scale) (uncond concat)
    # beff_ref : VMEM (Cout, 1)     bias + sigma * text-context modulation (folded)
    # out_ref  : VMEM (Cout, T)
    f32 = jnp.float32
    # Upcast right after load: v5e's VPU has no bf16; the casts ride spare VALU
    # slots and stay hidden under the dominant HBM DMA.
    z = z_ref[...].astype(f32)
    cc_c = ccc_ref[...].astype(f32)
    cc_u = ccu_ref[...].astype(f32)

    # Lane-dense contractions (Cout, K) @ (K, T); the CFG scalar mixes are
    # already folded into w1cc / w1cu / b_eff in the wrapper, so there is no
    # per-tile scalar work left in the kernel.
    acc = jnp.dot(w1z_ref[...], z, preferred_element_type=f32)
    acc = acc + jnp.dot(w1cc_ref[...], cc_c, preferred_element_type=f32)
    acc = acc + jnp.dot(w1cu_ref[...], cc_u, preferred_element_type=f32)
    out_ref[...] = (acc + beff_ref[...]).astype(out_ref.dtype)


def _pick_hw_tile(hw):
    # Small latents: one block / one grid step.  The whole working set is a
    # few hundred KB, and a single step avoids per-step overhead (~0.35 us)
    # plus the exposed pipeline prologue/epilogue of a 2-step grid.
    if hw <= 2048:
        return hw
    # Large latents: lane-dense tiles with >= 4 grid steps so that after the
    # "parallel" axis is sharded across v7x's two TensorCores each core still
    # runs >= 2 steps (i.e. keeps its own DMA/compute overlap).
    for cand in (8192, 4096, 2048, 1024, 512, 256, 128):
        if hw % cand == 0 and hw // cand >= 4:
            return cand
    return hw  # fallback: single full block (masked lanes if HW % 128 != 0)


def cfg_denoiser(z, sigma, cond, uncond, text_cfg_scale, image_cfg_scale, params,
                 out_dtype=jnp.bfloat16):
    """z: (1, C, H, W); sigma: (1,); cond/uncond: dicts with 'c_crossattn' [(1,S,D)]
    and 'c_concat' [(1,Ccat,H,W)].  Returns (1, Cout, H, W) in `out_dtype`."""
    assert z.shape[0] == 1, "CFGDenoiser assumes batch=1 (as in the PyTorch module)"
    _, c, h, w = z.shape
    hw = h * w
    tile = _pick_hw_tile(hw)
    f32 = jnp.float32

    # Keep NCHW channel ordering, just flatten spatial -> (C, HW): HW on lanes,
    # C on sublanes.  No forced f32 cast: bf16 latents/concat stream half the
    # HBM bytes and are upcast inside the kernel.  No 3x CFG duplication in HBM.
    z_f = z.reshape(c, hw)
    cc_c4 = cond['c_concat'][0]
    cc_u4 = uncond['c_concat'][0]
    ccat = cc_c4.shape[1]
    cc_c = cc_c4.reshape(ccat, hw)
    cc_u = cc_u4.reshape(ccat, hw)

    sigma_flat = sigma.reshape(-1).astype(f32)
    assert sigma_flat.shape[0] == 1, "expects a single sigma (batch=1)"

    # ---- grid-invariant hoisting (wrapper, O(Cout*D) work, done once) -------
    # CFG combine folded through the *linear* stand-in inner model:
    #   out = t*eps_cond + (im-t)*eps_img + (1-im)*eps_uncond
    # z / bias coefficients sum to 1; c_crossattn collapses to a t-mix that is
    # folded into the bias; c_concat collapses to an im-mix that is folded into
    # two pre-scaled copies of the tiny concat weight.
    w1 = params['w1'].astype(f32)                     # (C+Ccat, Cout)
    c_out = w1.shape[1]
    w1z_t = w1[:c].T                                  # (Cout, C)
    w1c_t = w1[c:].T                                  # (Cout, Ccat)
    w1cc = image_cfg_scale * w1c_t                    # (Cout, Ccat) cond concat
    w1cu = (1.0 - image_cfg_scale) * w1c_t            # (Cout, Ccat) uncond concat

    ctx_c = cond['c_crossattn'][0][0].astype(f32)     # (S, D)
    ctx_u = uncond['c_crossattn'][0][0].astype(f32)   # (S, D)
    ctx_mix = (text_cfg_scale * jnp.mean(ctx_c, axis=0)
               + (1.0 - text_cfg_scale) * jnp.mean(ctx_u, axis=0))          # (D,)
    mod = sigma_flat[0] * (ctx_mix @ params['w2'].astype(f32))              # (Cout,)
    b_eff = (params['b1'].astype(f32).reshape(-1) + mod).reshape(c_out, 1)  # (Cout, 1)

    full = lambda j: (0, 0)
    out_flat = pl.pallas_call(
        _cfg_denoiser_kernel,
        out_shape=jax.ShapeDtypeStruct((c_out, hw), out_dtype),
        grid=(hw // tile,),
        in_specs=[
            pl.BlockSpec((c, tile), lambda j: (0, j)),               # z
            pl.BlockSpec((ccat, tile), lambda j: (0, j)),            # cc_cond
            pl.BlockSpec((ccat, tile), lambda j: (0, j)),            # cc_uncond
            pl.BlockSpec((c_out, c), full),                          # w1z_t
            pl.BlockSpec((c_out, ccat), full),                       # w1cc
            pl.BlockSpec((c_out, ccat), full),                       # w1cu
            pl.BlockSpec((c_out, 1), full),                          # b_eff
        ],
        out_specs=pl.BlockSpec((c_out, tile), lambda j: (0, j)),
        compiler_params=pltpu.CompilerParams(
            # HW tiles are independent -> shard across both TensorCores on v7x
            # (no-op on single-TC v5e/v6e).  Default scoped-VMEM limit is ample:
            # double-buffered blocks are a few hundred KB even at tile=8192.
            dimension_semantics=("parallel",),
        ),
    )(z_f, cc_c, cc_u, w1z_t, w1cc, w1cu, b_eff)

    return out_flat.reshape(1, c_out, h, w)


def _reference(z, sigma, cond, uncond, t, im, params):
    """Pure-JAX 3-branch reference of the same semantics (mirrors the PyTorch
    module: run the inner model on the 3 CFG branches, then combine)."""
    _, c, h, w = z.shape
    hw = h * w
    f32 = jnp.float32
    w1 = params['w1'].astype(f32)
    b1 = params['b1'].astype(f32)
    w2 = params['w2'].astype(f32)

    def inner(cc, ctx):
        hcat = jnp.concatenate([z.reshape(c, hw).T.astype(f32),
                                cc.reshape(-1, hw).T.astype(f32)], axis=-1)
        base = hcat @ w1 + b1                                  # (HW, Cout)
        mod = jnp.mean(ctx[0].astype(f32), axis=0) @ w2        # (Cout,)
        return base + sigma.reshape(-1)[0].astype(f32) * mod

    eps_cond = inner(cond['c_concat'][0], cond['c_crossattn'][0])
    eps_img = inner(cond['c_concat'][0], uncond['c_crossattn'][0])
    eps_unc = inner(uncond['c_concat'][0], uncond['c_crossattn'][0])
    out = eps_unc + t * (eps_cond - eps_img) + im * (eps_img - eps_unc)  # (HW, Cout)
    return out.T.reshape(1, -1, h, w)


if __name__ == "__main__":
    # Small shapes consistent with the forward: latent (1,4,16,16), text ctx (1,8,32).
    C, H, W = 4, 16, 16
    CCAT = 4
    S, D = 8, 32

    key = jax.random.PRNGKey(0)
    k = jax.random.split(key, 8)
    # Upstream supplies bf16 latents / concat conditioning (halves HBM traffic);
    # the kernel upcasts after load and accumulates in f32.
    z = jax.random.normal(k[0], (1, C, H, W), jnp.float32).astype(jnp.bfloat16)
    sigma = jnp.abs(jax.random.normal(k[1], (1,), jnp.float32)) + 0.1
    cond = {
        'c_crossattn': [jax.random.normal(k[2], (1, S, D), jnp.float32)],
        'c_concat':    [jax.random.normal(k[3], (1, CCAT, H, W), jnp.float32)
                        .astype(jnp.bfloat16)],
    }
    uncond = {
        'c_crossattn': [jax.random.normal(k[4], (1, S, D), jnp.float32)],
        'c_concat':    [jnp.zeros((1, CCAT, H, W), jnp.bfloat16)],
    }
    # Deterministic synthetic inner-model parameters.
    params = {
        'w1': jax.random.normal(k[5], (C + CCAT, C), jnp.float32) * 0.2,
        'b1': jax.random.normal(k[6], (1, C), jnp.float32) * 0.05,
        'w2': jax.random.normal(k[7], (D, C), jnp.float32) * 0.1,
    }
    text_cfg_scale = 7.5
    image_cfg_scale = 1.5

    out = cfg_denoiser(z, sigma, cond, uncond, text_cfg_scale, image_cfg_scale, params)
    out = jax.block_until_ready(out)

    ref = _reference(z, sigma, cond, uncond, text_cfg_scale, image_cfg_scale, params)
    assert out.shape == (1, C, H, W)
    # Tolerance covers the bf16 output rounding (inputs to kernel and reference
    # are the identical bf16 values, so the only deltas are accumulation order
    # and the final downcast).
    assert jnp.allclose(out.astype(jnp.float32), ref, rtol=1e-2, atol=1e-2), \
        "mismatch vs reference"
    print("KERNEL_OK")
</pallas_src>

<mosaic_0001>
module attributes {stable_mosaic.version = 11 : i64} {
  func.func @_cfg_denoiser_kernel(%arg0: i32, %arg1: memref<4x256xbf16, #tpu.memory_space<vmem>>, %arg2: memref<4x256xbf16, #tpu.memory_space<vmem>>, %arg3: memref<4x256xbf16, #tpu.memory_space<vmem>>, %arg4: memref<4x4xf32, #tpu.memory_space<vmem>>, %arg5: memref<4x4xf32, #tpu.memory_space<vmem>>, %arg6: memref<4x4xf32, #tpu.memory_space<vmem>>, %arg7: memref<4x1xf32, #tpu.memory_space<vmem>>, %arg8: memref<4x256xbf16, #tpu.memory_space<vmem>>) attributes {dimension_semantics = [#tpu.dimension_semantics<parallel>], iteration_bounds = array<i64: 1>, scalar_prefetch = 0 : i64, scratch_operands = 0 : i64, tpu.core_type = #tpu.core_type<tc>, window_params = [{transform_indices = @transform_0, window_bounds = array<i64: 4, 256>}, {transform_indices = @transform_1, window_bounds = array<i64: 4, 256>}, {transform_indices = @transform_2, window_bounds = array<i64: 4, 256>}, {pipeline_mode = #tpu.pipeline_mode<synchronous>, transform_indices = @transform_3, window_bounds = array<i64: 4, 4>}, {pipeline_mode = #tpu.pipeline_mode<synchronous>, transform_indices = @transform_4, window_bounds = array<i64: 4, 4>}, {pipeline_mode = #tpu.pipeline_mode<synchronous>, transform_indices = @transform_5, window_bounds = array<i64: 4, 4>}, {pipeline_mode = #tpu.pipeline_mode<synchronous>, transform_indices = @transform_6, window_bounds = array<i64: 4, 1>}, {transform_indices = @transform_7, window_bounds = array<i64: 4, 256>}]} {
    %c0 = arith.constant 0 : index
    %c0_0 = arith.constant 0 : index
    %0 = vector.load %arg1[%c0, %c0_0] : memref<4x256xbf16, #tpu.memory_space<vmem>>, vector<4x256xbf16>
    %1 = arith.extf %0 : vector<4x256xbf16> to vector<4x256xf32>
    %c0_1 = arith.constant 0 : index
    %c0_2 = arith.constant 0 : index
    %2 = vector.load %arg2[%c0_1, %c0_2] : memref<4x256xbf16, #tpu.memory_space<vmem>>, vector<4x256xbf16>
    %3 = arith.extf %2 : vector<4x256xbf16> to vector<4x256xf32>
    %c0_3 = arith.constant 0 : index
    %c0_4 = arith.constant 0 : index
    %4 = vector.load %arg3[%c0_3, %c0_4] : memref<4x256xbf16, #tpu.memory_space<vmem>>, vector<4x256xbf16>
    %5 = arith.extf %4 : vector<4x256xbf16> to vector<4x256xf32>
    %c0_5 = arith.constant 0 : index
    %c0_6 = arith.constant 0 : index
    %6 = vector.load %arg4[%c0_5, %c0_6] : memref<4x4xf32, #tpu.memory_space<vmem>>, vector<4x4xf32>
    %cst = arith.constant dense<0.000000e+00> : vector<4x256xf32>
    %7 = tpu.matmul %6, %1, %cst {dimension_numbers = #tpu.dot_dimension_numbers<[1], [0], [0], [1], [0, 0, 1, 1], [], []>} : vector<4x4xf32>, vector<4x256xf32>, vector<4x256xf32> -> vector<4x256xf32>
    %c0_7 = arith.constant 0 : index
    %c0_8 = arith.constant 0 : index
    %8 = vector.load %arg5[%c0_7, %c0_8] : memref<4x4xf32, #tpu.memory_space<vmem>>, vector<4x4xf32>
    %cst_9 = arith.constant dense<0.000000e+00> : vector<4x256xf32>
    %9 = tpu.matmul %8, %3, %cst_9 {dimension_numbers = #tpu.dot_dimension_numbers<[1], [0], [0], [1], [0, 0, 1, 1], [], []>} : vector<4x4xf32>, vector<4x256xf32>, vector<4x256xf32> -> vector<4x256xf32>
    %10 = arith.addf %7, %9 : vector<4x256xf32>
    %c0_10 = arith.constant 0 : index
    %c0_11 = arith.constant 0 : index
    %11 = vector.load %arg6[%c0_10, %c0_11] : memref<4x4xf32, #tpu.memory_space<vmem>>, vector<4x4xf32>
    %cst_12 = arith.constant dense<0.000000e+00> : vector<4x256xf32>
    %12 = tpu.matmul %11, %5, %cst_12 {dimension_numbers = #tpu.dot_dimension_numbers<[1], [0], [0], [1], [0, 0, 1, 1], [], []>} : vector<4x4xf32>, vector<4x256xf32>, vector<4x256xf32> -> vector<4x256xf32>
    %13 = arith.addf %10, %12 : vector<4x256xf32>
    %c0_13 = arith.constant 0 : index
    %c0_14 = arith.constant 0 : index
    %14 = vector.load %arg7[%c0_13, %c0_14] : memref<4x1xf32, #tpu.memory_space<vmem>>, vector<4x1xf32>
    %15 = vector.broadcast %14 : vector<4x1xf32> to vector<4x256xf32>
    %16 = arith.addf %13, %15 : vector<4x256xf32>
    %17 = arith.truncf %16 : vector<4x256xf32> to vector<4x256xbf16>
    %c0_15 = arith.constant 0 : index
    %c0_16 = arith.constant 0 : index
    %18 = vector.load %arg8[%c0_15, %c0_16] : memref<4x256xbf16, #tpu.memory_space<vmem>>, vector<4x256xbf16>
    tpu.vector_store %arg8[%c0_15, %c0_16], %17 {strides = array<i32>} : memref<4x256xbf16, #tpu.memory_space<vmem>>, vector<4x256xbf16>,
    return
  }
  func.func @transform_0(%arg0: i32) -> (i32, i32) {
    %c0_i32 = arith.constant 0 : i32
    %c0_i32_0 = arith.constant 0 : i32
    return %c0_i32, %arg0 : i32, i32
  }
  func.func @transform_1(%arg0: i32) -> (i32, i32) {
    %c0_i32 = arith.constant 0 : i32
    %c0_i32_0 = arith.constant 0 : i32
    return %c0_i32, %arg0 : i32, i32
  }
  func.func @transform_2(%arg0: i32) -> (i32, i32) {
    %c0_i32 = arith.constant 0 : i32
    %c0_i32_0 = arith.constant 0 : i32
    return %c0_i32, %arg0 : i32, i32
  }
  func.func @transform_3(%arg0: i32) -> (i32, i32) {
    %c0_i32 = arith.constant 0 : i32
    %c0_i32_0 = arith.constant 0 : i32
    %c0_i32_1 = arith.constant 0 : i32
    return %c0_i32, %c0_i32_0 : i32, i32
  }
  func.func @transform_4(%arg0: i32) -> (i32, i32) {
    %c0_i32 = arith.constant 0 : i32
    %c0_i32_0 = arith.constant 0 : i32
    %c0_i32_1 = arith.constant 0 : i32
    return %c0_i32, %c0_i32_0 : i32, i32
  }
  func.func @transform_5(%arg0: i32) -> (i32, i32) {
    %c0_i32 = arith.constant 0 : i32
    %c0_i32_0 = arith.constant 0 : i32
    %c0_i32_1 = arith.constant 0 : i32
    return %c0_i32, %c0_i32_0 : i32, i32
  }
  func.func @transform_6(%arg0: i32) -> (i32, i32) {
    %c0_i32 = arith.constant 0 : i32
    %c0_i32_0 = arith.constant 0 : i32
    %c0_i32_1 = arith.constant 0 : i32
    return %c0_i32, %c0_i32_0 : i32, i32
  }
  func.func @transform_7(%arg0: i32) -> (i32, i32) {
    %c0_i32 = arith.constant 0 : i32
    %c0_i32_0 = arith.constant 0 : i32
    return %c0_i32, %arg0 : i32, i32
  }
}

</mosaic_0001>

<bundles_post_ra>
// kernel: tpu_custom_call.1
= control target key start
LH: loop header
LB: loop body
LE: loop exit
PB: predicated region body
PF: predicated region fallthrough
CT: control target
= control target key end

     0   :  { %12 = vsyncpa [#allocation3], 0  ;;  %s489_s0 = inlined_call_operand.vmem [shape: bf16[4,256], index: 0, kind: input, shape index: {}]   ;;  %s490_s1 = inlined_call_operand.vmem [shape: bf16[4,256], index: 1, kind: input, shape index: {}]   ;;  %s491_s2 = inlined_call_operand.vmem [shape: bf16[4,256], index: 2, kind: input, shape index: {}]   ;;  %s492_s3 = inlined_call_operand.vmem [shape: f32[4,4], index: 3, kind: input, shape index: {}]   ;;  %s493_s4 = inlined_call_operand.vmem [shape: f32[4,4], index: 4, kind: input, shape index: {}]   ;;  %s494_s5 = inlined_call_operand.hbm [shape: f32[4,4], index: 5, kind: input, shape index: {}]   ;;  %s495_s6 = inlined_call_operand.vmem [shape: f32[4,1], index: 6, kind: input, shape index: {}]   ;;  %s496_s7 = inlined_call_operand.hbm [shape: bf16[4,256], index: 7, kind: output, shape index: {}]  }
   0x1   :  { %13 = vsyncpa [#allocation4], 0  ;;  %s397_s24 = smov [#allocation2]   ;;  %s349_s28 = scalar_lea.hbm %s494_s5, 64 }
   0x2   :  { %s30_s25 = sshll.u32 %s397_s24, 4  ;;  %p350_p0 = scmp.ne.s32.totalorder %s494_s5, %s349_s28  ;;  %s31_s25 = int_to_ptr.vmem [resolvable:$true] %s30_s25 }
   0x3   :  { %p353_p1 = scmp.lt.u32.totalorder %s349_s28, %s494_s5 }
   0x5   :  { %p355_p2 = pnand %p353_p1, %p350_p0 }
   0x7   :  { %358 = shalt.err (!%p355_p2)
}
   0x8   :  { %s359_s10 = scalar_lea.vmem %s31_s25, 64  ;;  %p364_p4 = scmp.lt.s32.totalorder %s31_s25, %s31_s25 }
   0x9   :  { %p360_p3 = scmp.ne.s32.totalorder %s31_s25, %s359_s10  ;;  %p365_p5 = scmp.lt.s32.totalorder %s359_s10, %s359_s10 }
   0xb   :  { %p366_p6 = por %p365_p5, %p364_p4 }
   0xd   :  { %p367_p7 = pnand %p366_p6, %p360_p3 }
   0xf   :  { %370 = shalt.err (!%p367_p7)
}
  0x10   :  { %33 = dma.hbm_to_vmem [thread:$0]  %s494_s5, 64, %s31_s25, [#allocation3]  }
  0x11   :  { %393 = dma.done.wait [#allocation3], 64  }
  0x12   :  { %394 = vsyncadd [#allocation3], 4294967232  ;;  %v398_v0 = vmov 0.0   ;;  %v399_v1 = vmov 0   ;;  %v39_v2 = vld [vmem:[%s489_s0] sm:$0xf] }
  0x13   :  { %202 = vmatprep.mubr.f32.mxu0 %v398_v0  ;;  %122 = vmatprep.mubr.f32.mxu1 %v398_v0  ;;  %v43_v3 = vld [vmem:[%s491_s2] sm:$0xf]  ;;  %v40_v4 = vunpack.c.l.bf16 %v39_v2  ;;  %vm53_vm0 = vcmask 1043456   ;;  %vm49_vm1 = vcmask 31744  }
  0x14   :  { %348 = vset.pattern.permute.xlu0 %v399_v1  ;;  %v44_v5 = vunpack.c.l.bf16 %v43_v3  ;;  %v41_v6 = vld [vmem:[%s490_s1] sm:$0xf] }
  0x15   :  { %v42_v7 = vunpack.c.l.bf16 %v41_v6  ;;  %v292_v8 = vld [vmem:[%s495_s6] sm:$0xf]  ;;  %v130_v9 = vcombine.high %v40_v4, %v40_v4 }
  0x16   :  { %v211_v10 = vcombine.high %v44_v5, %v44_v5  ;;  %295 = vperm.xlu0 %348, %v292_v8   ;;  %v45_v11 = vld [vmem:[%s492_s3] sm:$0xf]  ;;  %s400_s3 = smov [#allocation5]  }
  0x17   :  { %v48_v12 = vcombine.high %v42_v7, %v42_v7  ;;  %332 = vmatprep.subr.msk.mxu0 %vm53_vm0, %v130_v9  ;;  %v46_v13 = vld [vmem:[%s493_s4] sm:$0xf]  ;;  %s320_s4 = sshll.u32 %s400_s3, 4  ;;  %s321_s4 = int_to_ptr.vmem [resolvable:$true] %s320_s4 }
  0x18   :  { %333 = vmatpush1.msk.msra.mxu0 %vm53_vm0, %v40_v4  ;;  %v209_v14 = vld [vmem:[#allocation2] sm:$0xf]  ;;  %s371_s6 = scalar_lea.vmem %s321_s4, 64  ;;  %p376_p9 = scmp.lt.s32.totalorder %s321_s4, %s321_s4 }
  0x19   :  { %329 = vmatprep.subr.msk.mxu1 %vm53_vm0, %v48_v12  ;;  %334 = vmatmul.mubr.msk.f32.vlgmr.msra.gmra.mrb[0].mxu0 %vm49_vm1, %v45_v11  ;;  %p372_p8 = scmp.ne.s32.totalorder %s321_s4, %s371_s6  ;;  %p377_p10 = scmp.lt.s32.totalorder %s371_s6, %s371_s6 }
  0x1a   :  { %335 = vmatprep.subr.msk.mxu0 %vm53_vm0, %v211_v10  ;;  %330 = vmatpush1.msk.msra.mxu1 %vm53_vm0, %v42_v7 }
  0x1b   :  { %336 = vmatpush1.msk.msra.mxu0 %vm53_vm0, %v44_v5  ;;  %283 = vmatprep.mubr.f32.mxu0 %v398_v0  ;;  %p378_p11 = por %p377_p10, %p376_p9 }
  0x1c   :  { %331 = vmatmul.mubr.msk.f32.vlgmr.msra.gmra.mrb[0].mxu1 %vm49_vm1, %v46_v13 }
  0x1d   :  { %p379_p12 = pnand %p378_p11, %p372_p8 }
  0x21   :  { %337 = vmatmul.mubr.msk.f32.vlgmr.msra.gmra.mrb[0].mxu0 %vm49_vm1, %v209_v14 }
  0x95   :  { %v296_v18 = vpop.permute.xlu0 %295 }
  0xef   :  { %v124_v15 = vpop.f32.mrb[0].mxu1 }
  0xf0   :  { %v126_v16 = vpop.f32.mrb[1].mxu1 }
  0xf4   :  { %v285_v17 = vpop.f32.mrb[0].mxu0 }
  0xf5   :  { %v340_v19 = vadd.f32 %v285_v17, %v124_v15  ;;  %v287_v20 = vpop.f32.mrb[1].mxu0 }
  0xf6   :  { %v341_v21 = vadd.f32 %v287_v20, %v126_v16 }
  0xf7   :  { %v298_v22 = vadd.f32 %v340_v19, %v296_v18 }
  0xf8   :  { %v299_v23 = vadd.f32 %v341_v21, %v296_v18 }
  0xfa   :  { %v338_v24 = vpack.c.bf16 %v299_v23, %v298_v22 }
  0xfc   :  { %339 = vst.sshfl [vmem:[#allocation5] sm:$0x33 pattern:$0x76325410] %v338_v24 }
  0xfd   :  { %382 = shalt.err (!%p379_p12)
}
  0xfe   :  { %s383_s23 = scalar_lea.hbm %s496_s7, 64 }
  0xff   :  { %p384_p13 = scmp.ne.s32.totalorder %s496_s7, %s383_s23  ;;  %p387_p0 = scmp.lt.u32.totalorder %s383_s23, %s496_s7 }
 0x101   :  { %p389_p1 = pnand %p387_p0, %p384_p13 }
 0x103   :  { %392 = shalt.err (!%p389_p1)
}
 0x104   :  { %323 = dma.vmem_to_hbm [thread:$0]  %s321_s4, 64, %s496_s7, [#allocation4]  }
 0x105   :  { %395 = dma.done.wait [#allocation4], 64  }
 0x106   :  { %396 = vsyncadd [#allocation4], 4294967232 }
 0x107   :  { %327 = vsyncpa [#allocation3], 1 }
 0x108   :  { %328 = vsyncpa [#allocation4], 1 }

</bundles_post_ra>
